<compile_context>
chip_gen: v5e
topology: v5e:2x2
jax: 0.10.0
libtpu: 0.0.40
codegen_flags: <defaults>
</compile_context>

<pallas_src>
import functools

import jax
import jax.numpy as jnp
from jax.experimental import pallas as pl
from jax.experimental.pallas import tpu as pltpu

EPS = 1e-5
FEAT_PAD = 128  # lane-dense padded feature width for every weight / activation


def _widths(dim_in, dim_out, layer_num):
    # widths[i] = dim_in - (dim_in - dim_out) * i // layer_num, i = 0 .. layer_num
    return [dim_in - (dim_in - dim_out) * i // layer_num for i in range(layer_num + 1)]


# --------------------------------------------------------------------------- #
# Kernel
# --------------------------------------------------------------------------- #
def decoder_kernel(n_bn_layers, dim_latent, dim_in, z_ref, w_ref, v_ref, out_ref):
    """Fused decoder forward.

    z_ref   : [B, dim_latent]                (unpadded latent)
    w_ref   : [(n_bn_layers+1)*128, 128]     stacked zero-padded weight matrices
    v_ref   : [ceil((2n+2)/8)*8, 128]        rows: 2l=gamma_l, 2l+1=beta_l,
                                             2n=output bias, 2n+1=sigmoid mask
    out_ref : [B, dim_in]
    """
    inv_b = 1.0 / z_ref.shape[0]
    h = z_ref[...].astype(jnp.float32)

    # rep_layer + MLP layers: Linear (no bias; it cancels in training-mode BN)
    # -> fused BatchNorm1d (per-batch stats) -> ReLU.
    for l in range(n_bn_layers):
        if l == 0:
            # contract only the real K rows of W0; the rest are zero anyway.
            w = w_ref[pl.ds(0, dim_latent), :]
        else:
            w = w_ref[pl.ds(l * FEAT_PAD, FEAT_PAD), :]
        g = v_ref[pl.ds(2 * l, 1), :]
        be = v_ref[pl.ds(2 * l + 1, 1), :]

        y = jnp.dot(h, w, preferred_element_type=jnp.float32)
        # One-pass statistics + single fused scale/shift epilogue.
        s1 = jnp.sum(y, axis=0, keepdims=True)
        s2 = jnp.sum(y * y, axis=0, keepdims=True)
        mu = s1 * inv_b
        var = s2 * inv_b - mu * mu
        scale = g * jax.lax.rsqrt(var + EPS)       # padded cols: gamma=0 -> scale=0
        shift = be - mu * scale                    # padded cols: beta=0  -> shift=0
        h = jnp.maximum(y * scale + shift, 0.0)    # padded cols stay exactly 0

    # output_layer (bias kept; no BN / ReLU)
    ow = w_ref[pl.ds(n_bn_layers * FEAT_PAD, FEAT_PAD), :]
    ob = v_ref[pl.ds(2 * n_bn_layers, 1), :]
    out = jnp.dot(h, ow, preferred_element_type=jnp.float32) + ob

    # x[:, bin_feats] = sigmoid(x[:, bin_feats]) via a precomputed (1,128) 0/1 row.
    mask = v_ref[pl.ds(2 * n_bn_layers + 1, 1), :]
    out = jnp.where(mask > 0.0, jax.nn.sigmoid(out), out)

    out_ref[...] = out[:, :dim_in]


# --------------------------------------------------------------------------- #
# Parameter init (mirrors the PyTorch module layer shapes) + packing
# --------------------------------------------------------------------------- #
def _decoder_layer_dims(config):
    dim_in = config["encoder_dim_in"]
    dim_latent = config["encoder_dim_latent"]
    dim_out = config["encoder_dim_out"]
    layer_num = config["encoder_layer_num"]
    widths = _widths(dim_in, dim_out, layer_num)

    # rep_layer: dim_latent -> widths[layer_num] (= dim_out)
    # mlp (i = layer_num-1 .. 1): widths[i+1] -> widths[i]
    bn_dims = [(dim_latent, widths[layer_num])] + [
        (widths[i + 1], widths[i]) for i in range(layer_num - 1, 0, -1)
    ]
    out_dims = (widths[1], dim_in)  # output_layer
    return bn_dims, out_dims


def init_decoder_params(key, config):
    """Deterministic synthetic parameters with PyTorch-module shapes (W as [in,out])."""
    bn_dims, (o_in, o_out) = _decoder_layer_dims(config)
    keys = iter(jax.random.split(key, 4 * len(bn_dims) + 2))

    bn_layers = []
    for fi, fo in bn_dims:
        w = 0.1 * jax.random.normal(next(keys), (fi, fo), jnp.float32)
        b = 0.1 * jax.random.normal(next(keys), (fo,), jnp.float32)
        g = 1.0 + 0.05 * jax.random.normal(next(keys), (fo,), jnp.float32)
        be = 0.05 * jax.random.normal(next(keys), (fo,), jnp.float32)
        bn_layers.append((w, b, g, be))
    ow = 0.1 * jax.random.normal(next(keys), (o_in, o_out), jnp.float32)
    ob = 0.1 * jax.random.normal(next(keys), (o_out,), jnp.float32)
    return {"bn_layers": bn_layers, "out_layer": (ow, ob)}


def _n_vec_rows_pad(n_layers):
    return -(-(2 * n_layers + 2) // 8) * 8


def pack_decoder_params(params, config, bin_feats):
    """Pack all parameters into two lane-dense, zero-padded slabs.

    BN-layer Linear biases are intentionally NOT packed: in training-mode
    BatchNorm the per-batch mean subtracts them right back out.
    """
    dim_in = config["encoder_dim_in"]
    assert max(bin_feats) < dim_in, "bin_feats index out of bounds!"

    bn_layers = params["bn_layers"]
    ow, ob = params["out_layer"]
    n_layers = len(bn_layers)

    w_slab = jnp.zeros(((n_layers + 1) * FEAT_PAD, FEAT_PAD), jnp.float32)
    v_slab = jnp.zeros((_n_vec_rows_pad(n_layers), FEAT_PAD), jnp.float32)

    for l, (w, _b, g, be) in enumerate(bn_layers):
        fi, fo = w.shape
        w_slab = w_slab.at[l * FEAT_PAD : l * FEAT_PAD + fi, :fo].set(w)
        v_slab = v_slab.at[2 * l, :fo].set(g)       # padded gamma cols stay 0
        v_slab = v_slab.at[2 * l + 1, :fo].set(be)  # padded beta  cols stay 0
    fi, fo = ow.shape
    w_slab = w_slab.at[n_layers * FEAT_PAD : n_layers * FEAT_PAD + fi, :fo].set(ow)
    v_slab = v_slab.at[2 * n_layers, :fo].set(ob)
    # 0/1 sigmoid column mask in the spare row.
    idx = jnp.asarray(list(bin_feats), jnp.int32)
    v_slab = v_slab.at[2 * n_layers + 1, idx].set(1.0)
    return w_slab, v_slab


# --------------------------------------------------------------------------- #
# Forward wrapper
# --------------------------------------------------------------------------- #
def make_decoder_forward(config):
    dim_in = config["encoder_dim_in"]
    dim_latent = config["encoder_dim_latent"]
    layer_num = config["encoder_layer_num"]

    kernel = functools.partial(decoder_kernel, layer_num, dim_latent, dim_in)
    vmem = pltpu.MemorySpace.VMEM

    w_bytes = (layer_num + 1) * FEAT_PAD * FEAT_PAD * 4
    v_bytes = _n_vec_rows_pad(layer_num) * FEAT_PAD * 4

    @jax.jit
    def forward(z, w_slab, v_slab):
        batch = z.shape[0]
        act_bytes = batch * FEAT_PAD * 4
        # slab + z/out I/O + ~a dozen live (B,128) f32 temporaries, capped at
        # 64 MiB (v7x physical VMEM).
        vmem_limit = int(
            min(64 << 20, max(4 << 20, w_bytes + v_bytes + 16 * act_bytes + (1 << 20)))
        )
        cost = pl.CostEstimate(
            flops=2 * batch * FEAT_PAD * (dim_latent + layer_num * FEAT_PAD),
            transcendentals=batch * FEAT_PAD + layer_num * FEAT_PAD,
            bytes_accessed=batch * dim_latent * 4 + w_bytes + v_bytes + batch * dim_in * 4,
        )
        return pl.pallas_call(
            kernel,
            out_shape=jax.ShapeDtypeStruct((batch, dim_in), jnp.float32),
            in_specs=[pl.BlockSpec(memory_space=vmem)] * 3,
            out_specs=pl.BlockSpec(memory_space=vmem),
            compiler_params=pltpu.CompilerParams(vmem_limit_bytes=vmem_limit),
            cost_estimate=cost,
        )(z, w_slab, v_slab)

    return forward


# --------------------------------------------------------------------------- #
# Pure-JAX reference (unpadded params, with BN-layer bias) for validation
# --------------------------------------------------------------------------- #
def reference_forward(z, params, bin_feats):
    h = z.astype(jnp.float32)
    for w, b, g, be in params["bn_layers"]:
        y = h @ w + b
        mu = jnp.mean(y, axis=0, keepdims=True)
        var = jnp.mean((y - mu) ** 2, axis=0, keepdims=True)
        h = jnp.maximum((y - mu) / jnp.sqrt(var + EPS) * g + be, 0.0)
    ow, ob = params["out_layer"]
    x = h @ ow + ob
    idx = jnp.array(bin_feats)
    return x.at[:, idx].set(jax.nn.sigmoid(x[:, idx]))


if __name__ == "__main__":
    config = {
        "encoder_dim_in": 32,
        "encoder_dim_latent": 8,
        "encoder_dim_out": 16,
        "encoder_layer_num": 2,
    }
    batch = 8
    bin_feats = [0, 3, 7, 12]

    root = jax.random.PRNGKey(0)
    k_params, k_z = jax.random.split(root)

    params = init_decoder_params(k_params, config)
    w_slab, v_slab = pack_decoder_params(params, config, bin_feats)  # packed once
    z = jax.random.normal(k_z, (batch, config["encoder_dim_latent"]), jnp.float32)

    forward = make_decoder_forward(config)
    out = forward(z, w_slab, v_slab)
    jax.block_until_ready(out)

    # shape / finiteness / sigmoid-range checks
    assert out.shape == (batch, config["encoder_dim_in"])
    assert bool(jnp.all(jnp.isfinite(out)))
    bin_cols = out[:, jnp.array(bin_feats)]
    assert bool(jnp.all((bin_cols > 0.0) & (bin_cols < 1.0)))

    # numerics check against an unpadded pure-JAX reference (with BN biases)
    ref = reference_forward(z, params, bin_feats)
    assert bool(jnp.allclose(out, ref, rtol=1e-4, atol=1e-4))

    print("KERNEL_OK")
</pallas_src>

<mosaic_0001>
module attributes {stable_mosaic.version = 11 : i64} {
  func.func @decoder_kernel(%arg0: memref<8x8xf32, #tpu.memory_space<vmem>>, %arg1: memref<384x128xf32, #tpu.memory_space<vmem>>, %arg2: memref<8x128xf32, #tpu.memory_space<vmem>>, %arg3: memref<8x32xf32, #tpu.memory_space<vmem>>) attributes {dimension_semantics = [], scalar_prefetch = 0 : i64, scratch_operands = 0 : i64, tpu.core_type = #tpu.core_type<tc>} {
    %c0 = arith.constant 0 : index
    %c0_0 = arith.constant 0 : index
    %0 = vector.load %arg0[%c0, %c0_0] : memref<8x8xf32, #tpu.memory_space<vmem>>, vector<8x8xf32>
    %c0_1 = arith.constant 0 : index
    %c0_2 = arith.constant 0 : index
    %1 = vector.load %arg1[%c0_1, %c0_2] : memref<384x128xf32, #tpu.memory_space<vmem>>, vector<8x128xf32>
    %c0_3 = arith.constant 0 : index
    %c0_4 = arith.constant 0 : index
    %2 = vector.load %arg2[%c0_3, %c0_4] : memref<8x128xf32, #tpu.memory_space<vmem>>, vector<1x128xf32>
    %c1 = arith.constant 1 : index
    %c0_5 = arith.constant 0 : index
    %3 = vector.load %arg2[%c1, %c0_5] : memref<8x128xf32, #tpu.memory_space<vmem>>, vector<1x128xf32>
    %cst = arith.constant dense<0.000000e+00> : vector<8x128xf32>
    %4 = tpu.matmul %0, %1, %cst {dimension_numbers = #tpu.dot_dimension_numbers<[1], [0], [0], [1], [0, 0, 1, 1], [], []>} : vector<8x8xf32>, vector<8x128xf32>, vector<8x128xf32> -> vector<8x128xf32>
    %cst_6 = arith.constant dense<0.000000e+00> : vector<128xf32>
    %5 = vector.multi_reduction <add>, %4, %cst_6 [0] : vector<8x128xf32> to vector<128xf32>
    %6 = vector.shape_cast %5 : vector<128xf32> to vector<1x128xf32>
    %7 = arith.mulf %4, %4 : vector<8x128xf32>
    %cst_7 = arith.constant dense<0.000000e+00> : vector<128xf32>
    %8 = vector.multi_reduction <add>, %7, %cst_7 [0] : vector<8x128xf32> to vector<128xf32>
    %9 = vector.shape_cast %8 : vector<128xf32> to vector<1x128xf32>
    %cst_8 = arith.constant 1.250000e-01 : f32
    %10 = vector.broadcast %cst_8 : f32 to vector<1x128xf32>
    %11 = arith.mulf %6, %10 : vector<1x128xf32>
    %cst_9 = arith.constant 1.250000e-01 : f32
    %12 = vector.broadcast %cst_9 : f32 to vector<1x128xf32>
    %13 = arith.mulf %9, %12 : vector<1x128xf32>
    %14 = arith.mulf %11, %11 : vector<1x128xf32>
    %15 = arith.subf %13, %14 : vector<1x128xf32>
    %cst_10 = arith.constant 9.99999974E-6 : f32
    %16 = vector.broadcast %cst_10 : f32 to vector<1x128xf32>
    %17 = arith.addf %15, %16 : vector<1x128xf32>
    %18 = math.rsqrt %17 : vector<1x128xf32>
    %19 = arith.mulf %2, %18 : vector<1x128xf32>
    %20 = arith.mulf %11, %19 : vector<1x128xf32>
    %21 = arith.subf %3, %20 : vector<1x128xf32>
    %22 = vector.broadcast %19 : vector<1x128xf32> to vector<8x128xf32>
    %23 = arith.mulf %4, %22 : vector<8x128xf32>
    %24 = vector.broadcast %21 : vector<1x128xf32> to vector<8x128xf32>
    %25 = arith.addf %23, %24 : vector<8x128xf32>
    %cst_11 = arith.constant 0.000000e+00 : f32
    %26 = vector.broadcast %cst_11 : f32 to vector<8x128xf32>
    %27 = arith.maximumf %25, %26 : vector<8x128xf32>
    %c128 = arith.constant 128 : index
    %c0_12 = arith.constant 0 : index
    %28 = vector.load %arg1[%c128, %c0_12] : memref<384x128xf32, #tpu.memory_space<vmem>>, vector<128x128xf32>
    %c2 = arith.constant 2 : index
    %c0_13 = arith.constant 0 : index
    %29 = vector.load %arg2[%c2, %c0_13] : memref<8x128xf32, #tpu.memory_space<vmem>>, vector<1x128xf32>
    %c3 = arith.constant 3 : index
    %c0_14 = arith.constant 0 : index
    %30 = vector.load %arg2[%c3, %c0_14] : memref<8x128xf32, #tpu.memory_space<vmem>>, vector<1x128xf32>
    %cst_15 = arith.constant dense<0.000000e+00> : vector<8x128xf32>
    %31 = tpu.matmul %27, %28, %cst_15 {dimension_numbers = #tpu.dot_dimension_numbers<[1], [0], [0], [1], [0, 0, 1, 1], [], []>} : vector<8x128xf32>, vector<128x128xf32>, vector<8x128xf32> -> vector<8x128xf32>
    %cst_16 = arith.constant dense<0.000000e+00> : vector<128xf32>
    %32 = vector.multi_reduction <add>, %31, %cst_16 [0] : vector<8x128xf32> to vector<128xf32>
    %33 = vector.shape_cast %32 : vector<128xf32> to vector<1x128xf32>
    %34 = arith.mulf %31, %31 : vector<8x128xf32>
    %cst_17 = arith.constant dense<0.000000e+00> : vector<128xf32>
    %35 = vector.multi_reduction <add>, %34, %cst_17 [0] : vector<8x128xf32> to vector<128xf32>
    %36 = vector.shape_cast %35 : vector<128xf32> to vector<1x128xf32>
    %cst_18 = arith.constant 1.250000e-01 : f32
    %37 = vector.broadcast %cst_18 : f32 to vector<1x128xf32>
    %38 = arith.mulf %33, %37 : vector<1x128xf32>
    %cst_19 = arith.constant 1.250000e-01 : f32
    %39 = vector.broadcast %cst_19 : f32 to vector<1x128xf32>
    %40 = arith.mulf %36, %39 : vector<1x128xf32>
    %41 = arith.mulf %38, %38 : vector<1x128xf32>
    %42 = arith.subf %40, %41 : vector<1x128xf32>
    %cst_20 = arith.constant 9.99999974E-6 : f32
    %43 = vector.broadcast %cst_20 : f32 to vector<1x128xf32>
    %44 = arith.addf %42, %43 : vector<1x128xf32>
    %45 = math.rsqrt %44 : vector<1x128xf32>
    %46 = arith.mulf %29, %45 : vector<1x128xf32>
    %47 = arith.mulf %38, %46 : vector<1x128xf32>
    %48 = arith.subf %30, %47 : vector<1x128xf32>
    %49 = vector.broadcast %46 : vector<1x128xf32> to vector<8x128xf32>
    %50 = arith.mulf %31, %49 : vector<8x128xf32>
    %51 = vector.broadcast %48 : vector<1x128xf32> to vector<8x128xf32>
    %52 = arith.addf %50, %51 : vector<8x128xf32>
    %cst_21 = arith.constant 0.000000e+00 : f32
    %53 = vector.broadcast %cst_21 : f32 to vector<8x128xf32>
    %54 = arith.maximumf %52, %53 : vector<8x128xf32>
    %c256 = arith.constant 256 : index
    %c0_22 = arith.constant 0 : index
    %55 = vector.load %arg1[%c256, %c0_22] : memref<384x128xf32, #tpu.memory_space<vmem>>, vector<128x128xf32>
    %c4 = arith.constant 4 : index
    %c0_23 = arith.constant 0 : index
    %56 = vector.load %arg2[%c4, %c0_23] : memref<8x128xf32, #tpu.memory_space<vmem>>, vector<1x128xf32>
    %cst_24 = arith.constant dense<0.000000e+00> : vector<8x128xf32>
    %57 = tpu.matmul %54, %55, %cst_24 {dimension_numbers = #tpu.dot_dimension_numbers<[1], [0], [0], [1], [0, 0, 1, 1], [], []>} : vector<8x128xf32>, vector<128x128xf32>, vector<8x128xf32> -> vector<8x128xf32>
    %58 = vector.broadcast %56 : vector<1x128xf32> to vector<8x128xf32>
    %59 = arith.addf %57, %58 : vector<8x128xf32>
    %c5 = arith.constant 5 : index
    %c0_25 = arith.constant 0 : index
    %60 = vector.load %arg2[%c5, %c0_25] : memref<8x128xf32, #tpu.memory_space<vmem>>, vector<1x128xf32>
    %cst_26 = arith.constant 0.000000e+00 : f32
    %61 = vector.broadcast %cst_26 : f32 to vector<1x128xf32>
    %62 = arith.cmpf ogt, %60, %61 : vector<1x128xf32>
    %63 = arith.negf %59 : vector<8x128xf32>
    %64 = math.exp %63 : vector<8x128xf32>
    %cst_27 = arith.constant 1.000000e+00 : f32
    %65 = vector.broadcast %cst_27 : f32 to vector<8x128xf32>
    %66 = arith.addf %65, %64 : vector<8x128xf32>
    %67 = arith.divf %65, %66 : vector<8x128xf32>
    %68 = vector.shape_cast %62 : vector<1x128xi1> to vector<1x128xi1>
    %69 = vector.broadcast %68 : vector<1x128xi1> to vector<8x128xi1>
    %70 = arith.select %69, %67, %59 : vector<8x128xi1>, vector<8x128xf32>
    %71 = vector.extract_strided_slice %70 {offsets = [0, 0], sizes = [8, 32], strides = [1, 1]} : vector<8x128xf32> to vector<8x32xf32>
    %c0_28 = arith.constant 0 : index
    %c0_29 = arith.constant 0 : index
    %72 = vector.load %arg3[%c0_28, %c0_29] : memref<8x32xf32, #tpu.memory_space<vmem>>, vector<8x32xf32>
    tpu.vector_store %arg3[%c0_28, %c0_29], %71 {strides = array<i32>} : memref<8x32xf32, #tpu.memory_space<vmem>>, vector<8x32xf32>,
    return
  }
}

</mosaic_0001>

<bundles_post_ra>
// kernel: forward.1
= control target key start
LH: loop header
LB: loop body
LE: loop exit
PB: predicated region body
PF: predicated region fallthrough
CT: control target
= control target key end

     0   :  { %8 = vsyncpa [#allocation3], 0  ;;  %s438_s0 = inlined_call_operand.hbm [shape: f32[8,8], index: 0, kind: input, shape index: {}]   ;;  %s439_s1 = inlined_call_operand.hbm [shape: f32[384,128], index: 1, kind: input, shape index: {}]   ;;  %s440_s2 = inlined_call_operand.hbm [shape: f32[8,128], index: 2, kind: input, shape index: {}]   ;;  %s441_s3 = inlined_call_operand.hbm [shape: f32[8,32], index: 3, kind: output, shape index: {}]  }
   0x1   :  { %9 = vsyncpa [#allocation6], 0  ;;  %s26_s14 = sshll.u32 %s439_s1, 4  ;;  %s27_s14 = int_to_ptr.hbm [resolvable:$true] %s26_s14 }
   0x2   :  { %10 = vsyncpa [#allocation4], 0  ;;  %s399_s15 = smov [#allocation5]   ;;  %s16_s19 = sshll.u32 %s438_s0, 4  ;;  %s17_s19 = int_to_ptr.hbm [resolvable:$true] %s16_s19 }
   0x3   :  { %s28_s16 = sshll.u32 %s399_s15, 4  ;;  %s400_s20 = smov 128   ;;  %s29_s16 = int_to_ptr.vmem [resolvable:$true] %s28_s16 }
   0x4   :  { %s401_s21 = smov 8   ;;  %s402_s22 = smov [#allocation2]  }
   0x5   :  { %34 = dma.hbm_to_vmem [thread:$0]  %s27_s14, 6144, %s29_s16, [#allocation6], %s400_s20, %s400_s20, %s401_s21  }
   0x6   :  { %s18_s23 = sshll.u32 %s402_s22, 4  ;;  %s40_s26 = sshll.u32 %s440_s2, 4  ;;  %s19_s23 = int_to_ptr.vmem [resolvable:$true] %s18_s23  ;;  %s41_s26 = int_to_ptr.hbm [resolvable:$true] %s40_s26 }
   0x7   :  { %21 = dma.hbm_to_vmem [thread:$0]  %s17_s19, 128, %s19_s23, [#allocation3]  }
   0x8   :  { %s403_s1 = smov [#allocation7]  }
   0x9   :  { %s42_s27 = sshll.u32 %s403_s1, 4  ;;  %s43_s27 = int_to_ptr.vmem [resolvable:$true] %s42_s27 }
   0xa   :  { %45 = dma.hbm_to_vmem [thread:$0]  %s41_s26, 128, %s43_s27, [#allocation6]  }
   0xb   :  { %393 = dma.done.wait [#allocation3], 128  }
   0xc   :  { %394 = vsyncadd [#allocation3], 4294967168 }
   0xd   :  { %395 = dma.done.wait [#allocation6], 6272  }
   0xe   :  { %396 = vsyncadd [#allocation6], 4294961024  ;;  %vm62_vm0 = vcmask 64512   ;;  %v59_v0 = vld [vmem:[#allocation5] sm:$0xff]  ;;  %v58_v1 = vld [vmem:[#allocation2] sm:$0xff]  ;;  %s405_s0 = smov [#allocation8]  }
   0xf   :  { %81 = vmatpush.msra.mxu0 %v59_v0  ;;  %v137_v2 = vld [vmem:[#allocation5 + $0xf8] sm:$0xff]  ;;  %v136_v3 = vld [vmem:[#allocation5 + $0xf0] sm:$0xff]  ;;  %v135_v4 = vld [vmem:[#allocation5 + $0xe8] sm:$0xff]  ;;  %s266_s2 = sshll.u32 %s405_s0, 4  ;;  %s268_s30 = sshll.u32 %s441_s3, 4  ;;  %vm259_vm13 = vcmask 261120   ;;  %s267_s2 = int_to_ptr.vmem [resolvable:$true] %s266_s2  ;;  %s269_s30 = int_to_ptr.hbm [resolvable:$true] %s268_s30 }
  0x10   :  { %279 = vmatmul.msk.f32.vlgmr.msra.gmra.mxu0 %vm62_vm0, %v58_v1  ;;  %140 = vmatpush.msra.mxu1 %v137_v2  ;;  %v134_v5 = vld [vmem:[#allocation5 + $0xe0] sm:$0xff]  ;;  %v133_v6 = vld [vmem:[#allocation5 + $0xd8] sm:$0xff]  ;;  %v132_v7 = vld [vmem:[#allocation5 + $0xd0] sm:$0xff] }
  0x11   :  { %v131_v8 = vld [vmem:[#allocation5 + $0xc8] sm:$0xff]  ;;  %v130_v12 = vld [vmem:[#allocation5 + $0xc0] sm:$0xff]  ;;  %v129_v15 = vld [vmem:[#allocation5 + $0xb8] sm:$0xff] }
  0x12   :  { %141 = vmatpush.msra.mxu1 %v136_v3  ;;  %v128_v18 = vld [vmem:[#allocation5 + $0xb0] sm:$0xff]  ;;  %v127_v21 = vld [vmem:[#allocation5 + $0xa8] sm:$0xff]  ;;  %v126_v24 = vld [vmem:[#allocation5 + $0xa0] sm:$0xff] }
  0x13   :  { %v125_v27 = vld [vmem:[#allocation5 + $0x98] sm:$0xff]  ;;  %v124_v28 = vld [vmem:[#allocation5 + $0x90] sm:$0xff]  ;;  %v123_v31 = vld [vmem:[#allocation5 + $0x88] sm:$0xff] }
  0x14   :  { %142 = vmatpush.msra.mxu1 %v135_v4  ;;  %v122_v34 = vld [vmem:[#allocation5 + $0x80] sm:$0xff]  ;;  %v211_v54 = vld [vmem:[#allocation5 + $0x178] sm:$0xff]  ;;  %v210_v55 = vld [vmem:[#allocation5 + $0x170] sm:$0xff] }
  0x15   :  { %v60_v42 = vld [vmem:[#allocation7] sm:$0x1]  ;;  %v61_v46 = vld [vmem:[#allocation7 + $0x1] sm:$0x1]  ;;  %214 = vmatpush.msra.mxu2 %v211_v54  ;;  %v209_v56 = vld [vmem:[#allocation5 + $0x168] sm:$0xff] }
  0x16   :  { %143 = vmatpush.msra.mxu1 %v134_v5  ;;  %v208_v57 = vld [vmem:[#allocation5 + $0x160] sm:$0xff]  ;;  %v207_v58 = vld [vmem:[#allocation5 + $0x158] sm:$0xff]  ;;  %v206_v59 = vld [vmem:[#allocation5 + $0x150] sm:$0xff] }
  0x17   :  { %215 = vmatpush.msra.mxu2 %v210_v55  ;;  %v205_v60 = vld [vmem:[#allocation5 + $0x148] sm:$0xff]  ;;  %v204_v0 = vld [vmem:[#allocation5 + $0x140] sm:$0xff]  ;;  %v203_v3 = vld [vmem:[#allocation5 + $0x138] sm:$0xff] }
  0x18   :  { %144 = vmatpush.msra.mxu1 %v133_v6  ;;  %v202_v6 = vld [vmem:[#allocation5 + $0x130] sm:$0xff] }
  0x19   :  { %216 = vmatpush.msra.mxu2 %v209_v56 }
  0x1a   :  { %145 = vmatpush.msra.mxu1 %v132_v7 }
  0x1b   :  { %217 = vmatpush.msra.mxu2 %v208_v57 }
  0x1c   :  { %146 = vmatpush.msra.mxu1 %v131_v8 }
  0x1d   :  { %218 = vmatpush.msra.mxu2 %v207_v58 }
  0x1e   :  { %147 = vmatpush.msra.mxu1 %v130_v12  ;;  %v200_v12 = vld [vmem:[#allocation5 + $0x120] sm:$0xff] }
  0x1f   :  { %219 = vmatpush.msra.mxu2 %v206_v59 }
  0x20   :  { %148 = vmatpush.msra.mxu1 %v129_v15  ;;  %v199_v15 = vld [vmem:[#allocation5 + $0x118] sm:$0xff] }
  0x21   :  { %220 = vmatpush.msra.mxu2 %v205_v60 }
  0x22   :  { %149 = vmatpush.msra.mxu1 %v128_v18 }
  0x23   :  { %221 = vmatpush.msra.mxu2 %v204_v0 }
  0x24   :  { %150 = vmatpush.msra.mxu1 %v127_v21 }
  0x25   :  { %222 = vmatpush.msra.mxu2 %v203_v3 }
  0x26   :  { %151 = vmatpush.msra.mxu1 %v126_v24 }
  0x27   :  { %223 = vmatpush.msra.mxu2 %v202_v6 }
  0x28   :  { %152 = vmatpush.msra.mxu1 %v125_v27 }
  0x2a   :  { %153 = vmatpush.msra.mxu1 %v124_v28 }
  0x2c   :  { %154 = vmatpush.msra.mxu1 %v123_v31 }
  0x2e   :  { %155 = vmatpush.msra.mxu1 %v122_v34  ;;  %v139_v34 = vld [vmem:[#allocation7 + $0x3] sm:$0x1] }
  0x8d   :  { %v83_v9 = vpop.f32.mrf.mxu0 }
  0x8e   :  { %v86_v10 = vrot.slane %v83_v9, 4  ;;  %v92_v11 = vmul.f32 %v83_v9, %v83_v9 }
  0x90   :  { %v87_v13 = vadd.f32 %v86_v10, %v83_v9  ;;  %v93_v14 = vrot.slane %v92_v11, 4 }
  0x92   :  { %v88_v16 = vrot.slane %v87_v13, 2  ;;  %v94_v17 = vadd.f32 %v93_v14, %v92_v11 }
  0x94   :  { %v89_v19 = vadd.f32 %v88_v16, %v87_v13  ;;  %v95_v20 = vrot.slane %v94_v17, 2  ;;  %v198_v16 = vld [vmem:[#allocation5 + $0x110] sm:$0xff] }
  0x96   :  { %v90_v22 = vrot.slane %v89_v19, 1  ;;  %v96_v23 = vadd.f32 %v95_v20, %v94_v17 }
  0x98   :  { %v91_v25 = vadd.f32 %v90_v22, %v89_v19  ;;  %v97_v26 = vrot.slane %v96_v23, 1  ;;  %v197_v19 = vld [vmem:[#allocation5 + $0x108] sm:$0xff]  ;;  %v196_v22 = vld [vmem:[#allocation5 + $0x100] sm:$0xff] }
  0x9a   :  { %v98_v29 = vadd.f32 %v97_v26, %v96_v23  ;;  %v99_v30 = vmul.f32 0.125, %v91_v25 }
  0x9c   :  { %v100_v32 = vmul.f32 0.125, %v98_v29  ;;  %v101_v33 = vmul.f32 %v99_v30, %v99_v30 }
  0x9e   :  { %v102_v35 = vsub.f32 %v100_v32, %v101_v33 }
  0xa0   :  { %v103_v36 = vadd.f32 1e-05, %v102_v35 }
  0xa2   :  { %289 = vrsqrt.f32 %v103_v36  ;;  %vm110_vm2 = vweird.f32 %v103_v36 }
  0xa8   :  { %v290_v37 = vpop.eup %289 }
  0xa9   :  { %v105_v38 = vmul.f32 %v290_v37, %v103_v36  ;;  %vm111_vm1 = vweird.f32 %v290_v37 }
  0xaa   :  { %vm112_vm3 = vmor %vm110_vm2, %vm111_vm1 }
  0xab   :  { %v106_v39 = vmul.f32 %v290_v37, %v105_v38 }
  0xad   :  { %v107_v40 = vmul.f32 0.5, %v106_v39 }
  0xaf   :  { %v108_v41 = vsub.f32 1.5, %v107_v40 }
  0xb1   :  { %v109_v43 = vmul.f32 %v290_v37, %v108_v41 }
  0xb3   :  { %v113_v44 = vsel %vm112_vm3, %v290_v37, %v109_v43 }
  0xb4   :  { %v114_v45 = vmul.f32 %v113_v44, %v60_v42  ;;  %v288_v42 = vld [vmem:[#allocation7 + $0x4] ss:$0 sm:$0xff] }
  0xb6   :  { %v117_v47 = vperm.slane %v114_v45, 0  ;;  %v115_v48 = vmul.f32 %v114_v45, %v99_v30  ;;  %v138_v30 = vld [vmem:[#allocation7 + $0x2] sm:$0x1] }
  0xb8   :  { %v116_v49 = vsub.f32 %v61_v46, %v115_v48  ;;  %v118_v50 = vmul.f32 %v117_v47, %v83_v9  ;;  %v201_v9 = vld [vmem:[#allocation5 + $0x128] sm:$0xff]  ;;  %v234_v48 = vld [vmem:[#allocation7 + $0x5] sm:$0x1] }
  0xb9   :  { %224 = vmatpush.msra.mxu2 %v201_v9  ;;  %vm235_vm7 = vcmp.gt.f32.partialorder %v234_v48, 0.0 }
  0xba   :  { %v119_v51 = vperm.slane %v116_v49, 0 }
  0xbb   :  { %225 = vmatpush.msra.mxu2 %v200_v12 }
  0xbc   :  { %v120_v52 = vadd.f32 %v119_v51, %v118_v50  ;;  %v404_v51 = vmov 0  }
  0xbd   :  { %226 = vmatpush.msra.mxu2 %v199_v15 }
  0xbe   :  { %v121_v53 = vmax.f32 %v120_v52, 0.0  ;;  %v255_v52 = vsel %vm235_vm7, 1, %v404_v51 }
  0xbf   :  { %227 = vmatpush.msra.mxu2 %v198_v16  ;;  %v256_v55 = vperm.slane %v255_v52, 0 }
  0xc0   :  { %156 = vmatmul.f32.vlgmr.msra.gmra.mxu1 %v121_v53 }
  0xc1   :  { %228 = vmatpush.msra.mxu2 %v197_v19  ;;  %vm257_vm11 = vcmp.eq.s32.totalorder %v256_v55, 1 }
  0xc3   :  { %229 = vmatpush.msra.mxu2 %v196_v22 }
 0x13d   :  { %v157_v61 = vpop.f32.mrf.mxu1 }
 0x13e   :  { %v160_v62 = vrot.slane %v157_v61, 4  ;;  %v166_v63 = vmul.f32 %v157_v61, %v157_v61 }
 0x140   :  { %v161_v1 = vadd.f32 %v160_v62, %v157_v61  ;;  %v167_v2 = vrot.slane %v166_v63, 4 }
 0x142   :  { %v162_v4 = vrot.slane %v161_v1, 2  ;;  %v168_v5 = vadd.f32 %v167_v2, %v166_v63 }
 0x144   :  { %v163_v7 = vadd.f32 %v162_v4, %v161_v1  ;;  %v169_v8 = vrot.slane %v168_v5, 2 }
 0x146   :  { %v164_v10 = vrot.slane %v163_v7, 1  ;;  %v170_v11 = vadd.f32 %v169_v8, %v168_v5 }
 0x148   :  { %v165_v13 = vadd.f32 %v164_v10, %v163_v7  ;;  %v171_v14 = vrot.slane %v170_v11, 1 }
 0x14a   :  { %v172_v17 = vadd.f32 %v171_v14, %v170_v11  ;;  %v173_v18 = vmul.f32 0.125, %v165_v13 }
 0x14c   :  { %v174_v20 = vmul.f32 0.125, %v172_v17  ;;  %v175_v21 = vmul.f32 %v173_v18, %v173_v18 }
 0x14e   :  { %v176_v23 = vsub.f32 %v174_v20, %v175_v21 }
 0x150   :  { %v177_v24 = vadd.f32 1e-05, %v176_v23 }
 0x152   :  { %291 = vrsqrt.f32 %v177_v24  ;;  %vm184_vm5 = vweird.f32 %v177_v24 }
 0x158   :  { %v292_v25 = vpop.eup %291 }
 0x159   :  { %v179_v26 = vmul.f32 %v292_v25, %v177_v24  ;;  %vm185_vm4 = vweird.f32 %v292_v25 }
 0x15a   :  { %vm186_vm6 = vmor %vm184_vm5, %vm185_vm4 }
 0x15b   :  { %v180_v27 = vmul.f32 %v292_v25, %v179_v26 }
 0x15d   :  { %v181_v28 = vmul.f32 0.5, %v180_v27 }
 0x15f   :  { %v182_v29 = vsub.f32 1.5, %v181_v28 }
 0x161   :  { %v183_v31 = vmul.f32 %v292_v25, %v182_v29 }
 0x163   :  { %v187_v32 = vsel %vm186_vm6, %v292_v25, %v183_v31 }
 0x164   :  { %v188_v33 = vmul.f32 %v187_v32, %v138_v30 }
 0x166   :  { %v191_v35 = vperm.slane %v188_v33, 0  ;;  %v189_v36 = vmul.f32 %v188_v33, %v173_v18 }
 0x168   :  { %v190_v37 = vsub.f32 %v139_v34, %v189_v36  ;;  %v192_v38 = vmul.f32 %v191_v35, %v157_v61 }
 0x16a   :  { %v193_v39 = vperm.slane %v190_v37, 0 }
 0x16c   :  { %v194_v40 = vadd.f32 %v193_v39, %v192_v38 }
 0x16e   :  { %v195_v41 = vmax.f32 %v194_v40, 0.0 }
 0x170   :  { %230 = vmatmul.f32.vlgmr.msra.gmra.mxu2 %v195_v41 }
 0x1f3   :  { %v231_v43 = vpop.f32.mrf.mxu2 }
 0x1f4   :  { %v232_v44 = vadd.f32 %v288_v42, %v231_v43 }
 0x1f6   :  { %v280_v45 = vmul.f32 -1.442695, %v232_v44 }
 0x1f8   :  { %293 = vpow2.f32 %v280_v45 }
 0x1fe   :  { %v294_v46 = vpop.eup %293 }
 0x1ff   :  { %v239_v47 = vadd.f32 1.0, %v294_v46 }
 0x201   :  { %295 = vrcp.f32 %v239_v47  ;;  %v251_v54 = vand.u32 2147483648, %v239_v47  ;;  %v249_v57 = vand.u32 2147483647, %v239_v47  ;;  %vm245_vm9 = vweird.f32 %v239_v47 }
 0x203   :  { %v252_v59 = vor.u32 1.1754944e-38, %v251_v54  ;;  %vm250_vm12 = vcmp.eq.f32.partialorder %v249_v57, 8.507059e+37 }
 0x207   :  { %v296_v49 = vpop.eup %295 }
 0x208   :  { %v241_v50 = vmul.f32 %v296_v49, %v239_v47  ;;  %vm246_vm8 = vweird.f32 %v296_v49 }
 0x209   :  { %vm247_vm10 = vmor %vm245_vm9, %vm246_vm8 }
 0x20a   :  { %v242_v53 = vsub.f32 1.0, %v241_v50 }
 0x20c   :  { %v243_v56 = vmul.f32 %v296_v49, %v242_v53 }
 0x20e   :  { %v244_v58 = vadd.f32 %v296_v49, %v243_v56 }
 0x210   :  { %v248_v60 = vsel %vm247_vm10, %v296_v49, %v244_v58 }
 0x211   :  { %v253_v61 = vsel %vm250_vm12, %v252_v59, %v248_v60 }
 0x212   :  { %v258_v62 = vsel %vm257_vm11, %v253_v61, %v232_v44 }
 0x213   :  { %260 = vst.msk [vmem:[#allocation8] sm:$0xff] %vm259_vm13, %v258_v62 }
 0x214   :  { %271 = dma.vmem_to_hbm [thread:$0]  %s267_s2, 128, %s269_s30, [#allocation4]  }
 0x215   :  { %397 = dma.done.wait [#allocation4], 128  }
 0x216   :  { %398 = vsyncadd [#allocation4], 4294967168 }
 0x217   :  { %276 = vsyncpa [#allocation3], 1 }
 0x218   :  { %277 = vsyncpa [#allocation6], 1 }
 0x219   :  { %278 = vsyncpa [#allocation4], 1 }

</bundles_post_ra>
